<compile_context>
chip_gen: v5e
topology: v5e:2x2
jax: 0.10.0
libtpu: 0.0.40
codegen_flags: <defaults>
</compile_context>

<pallas_src>
import functools

import jax
import jax.numpy as jnp
from jax import lax
from jax.experimental import pallas as pl
from jax.experimental.pallas import tpu as pltpu

BATCH_SIZE = 256.0  # module-level `batch_size` constant used as the loss divisor
BETA = 5.0
REG = 0.01
LOG10_E = 0.43429448190325176  # log10(x) == log(x) * LOG10_E


def _pad_to(n, m):
    return ((n + m - 1) // m) * m


def _gde_loss_kernel(lu_ref, ue_ref, lpn_ref, ie_ref, out_ref, fu_acc, fpn_acc,
                     *, bp, valid_b, nk_u, nk_i, reg, divisor):
    k = pl.program_id(0)

    @pl.when(k == 0)
    def _init():
        fu_acc[...] = jnp.zeros_like(fu_acc)
        fpn_acc[...] = jnp.zeros_like(fpn_acc)

    # Streamed K-tiles: bf16 operands, f32 MXU accumulation into VMEM scratch.
    # Each side only runs for its own valid tile count (skip zero tiles).
    @pl.when(k < nk_u)
    def _user_dot():
        fu_acc[...] += jnp.dot(lu_ref[...], ue_ref[...],
                               preferred_element_type=jnp.float32)

    @pl.when(k < nk_i)
    def _item_dot():
        fpn_acc[...] += jnp.dot(lpn_ref[...], ie_ref[...],
                                preferred_element_type=jnp.float32)

    @pl.when(k == pl.num_programs(0) - 1)
    def _epilogue():
        fu = fu_acc[...]                       # (Bp, Dp)  final_user
        fp = fpn_acc[pl.ds(0, bp), :]          # (Bp, Dp)  final_pos  (ref slice)
        fn = fpn_acc[pl.ds(bp, bp), :]         # (Bp, Dp)  final_nega (ref slice)

        # adaptive loss, keepdims keeps clean (B, 1) vreg layouts
        res_nega = jnp.sum(fu * fn, axis=1, keepdims=True)           # (Bp, 1)
        res_pos = jnp.sum(fu * fp, axis=1, keepdims=True)            # (Bp, 1)
        sig_nega = jnp.minimum(jax.nn.sigmoid(res_nega), 0.99)       # .clamp(max=0.99)
        # .detach() only matters for gradients; forward values identical.
        nega_weight = 1.0 - jnp.log(1.0 - sig_nega) * LOG10_E        # 1 - log10(1 - s)
        z = res_pos - nega_weight * res_nega

        # -log(sigmoid(z)) == softplus(-z); stable formulation with log1p.
        softplus_neg_z = jnp.maximum(-z, 0.0) + jnp.log1p(jnp.exp(-jnp.abs(z)))

        # padded batch rows hold gathered row-0 data now -> mask both terms
        row_mask = (lax.broadcasted_iota(jnp.int32, (bp, 1), 0)
                    < valid_b).astype(jnp.float32)
        log_loss = jnp.sum(softplus_neg_z * row_mask)
        reg_rows = jnp.sum(fu * fu + fp * fp + fn * fn, axis=1, keepdims=True)
        reg_term = reg * jnp.sum(reg_rows * row_mask)

        out_ref[0, 0] = (log_loss + reg_term) / divisor


def gde_prepare(L_u, L_i, user_embed, item_embed, *, tk=4096,
                max_batch=int(BATCH_SIZE)):
    """__init__-style one-time packing.

    Pads each table's contraction dim to its own multiple of the K-tile, pads
    the latent dim to a lane multiple, and stores everything in bf16 so the
    per-call gather is the only HBM pass before the kernel reads the rows.
    """
    U, I, D = L_u.shape[0], L_i.shape[0], user_embed.shape[1]
    Dp = _pad_to(D, 128)
    tk = _pad_to(max(tk, 128), 128)
    tk = min(tk, _pad_to(max(U, I), 128))
    Bp = _pad_to(max(max_batch, 16), 16)

    # keep double-buffered input blocks + f32 accumulators under ~36 MiB
    # (safe for 64 MiB-VMEM v7x with compiler-scratch headroom)
    def _blk_bytes(t):
        return 2 * (3 * Bp * t + 2 * t * Dp) * 2 + 3 * Bp * Dp * 4

    while tk > 256 and _blk_bytes(tk) > 36 * 1024 * 1024:
        tk = _pad_to(tk // 2, 128)

    Kp_u = _pad_to(U, tk)
    Kp_i = _pad_to(I, tk)
    return dict(
        Lu=jnp.pad(L_u, ((0, 0), (0, Kp_u - U))).astype(jnp.bfloat16),
        Li=jnp.pad(L_i, ((0, 0), (0, Kp_i - I))).astype(jnp.bfloat16),
        ue=jnp.pad(user_embed, ((0, Kp_u - U), (0, Dp - D))).astype(jnp.bfloat16),
        ie=jnp.pad(item_embed, ((0, Kp_i - I), (0, Dp - D))).astype(jnp.bfloat16),
        tk=tk, Dp=Dp, Kp_u=Kp_u, Kp_i=Kp_i,
    )


def gde_forward(prep, user, pos_item, nega_item, reg=REG, divisor=BATCH_SIZE):
    """drop_out == 0 path of GDE.forward with loss_type='adaptive'."""
    B = user.shape[0]
    Bp = _pad_to(max(B, 16), 16)                 # bf16 sublane pack
    tk, Dp = prep["tk"], prep["Dp"]
    nk_u = prep["Kp_u"] // tk
    nk_i = prep["Kp_i"] // tk
    nk = max(nk_u, nk_i)
    pad = Bp - B

    # one bf16 gather per table; pos+neg fused into a single gather
    u_idx = jnp.pad(user, (0, pad))
    pn_idx = jnp.concatenate([jnp.pad(pos_item, (0, pad)),
                              jnp.pad(nega_item, (0, pad))])
    lu = jnp.take(prep["Lu"], u_idx, axis=0)     # (Bp, Kp_u)   bf16
    lpn = jnp.take(prep["Li"], pn_idx, axis=0)   # (2Bp, Kp_i)  bf16

    kern = functools.partial(_gde_loss_kernel, bp=Bp, valid_b=B,
                             nk_u=nk_u, nk_i=nk_i,
                             reg=float(reg), divisor=float(divisor))

    # VMEM limit derived from the actual block bytes; capped for 64 MiB v7x.
    blk_bytes = 2 * (3 * Bp * tk + 2 * tk * Dp) * 2 + 3 * Bp * Dp * 4
    vmem_limit = int(min(max(blk_bytes + (8 << 20), 16 << 20), 40 << 20))

    out = pl.pallas_call(
        kern,
        out_shape=jax.ShapeDtypeStruct((1, 1), jnp.float32),
        grid_spec=pltpu.PrefetchScalarGridSpec(
            num_scalar_prefetch=0,
            grid=(nk,),
            in_specs=[
                # clamp past each side's extent -> no new DMA for skipped tiles
                pl.BlockSpec((Bp, tk), lambda k: (0, jnp.minimum(k, nk_u - 1))),
                pl.BlockSpec((tk, Dp), lambda k: (jnp.minimum(k, nk_u - 1), 0)),
                pl.BlockSpec((2 * Bp, tk), lambda k: (0, jnp.minimum(k, nk_i - 1))),
                pl.BlockSpec((tk, Dp), lambda k: (jnp.minimum(k, nk_i - 1), 0)),
            ],
            out_specs=pl.BlockSpec(memory_space=pltpu.MemorySpace.SMEM),
            scratch_shapes=[
                pltpu.VMEM((Bp, Dp), jnp.float32),       # final_user accumulator
                pltpu.VMEM((2 * Bp, Dp), jnp.float32),   # [final_pos; final_nega]
            ],
        ),
        compiler_params=pltpu.CompilerParams(
            dimension_semantics=("arbitrary",),          # K-reduction axis
            vmem_limit_bytes=vmem_limit,
        ),
    )(lu, prep["ue"], lpn, prep["ie"])
    return out[0, 0]


def gde_forward_ref(L_u, L_i, user_embed, item_embed, user, pos_item, nega_item,
                    reg=REG, divisor=BATCH_SIZE):
    """Pure-JAX f32 reference of the same forward pass."""
    fu = L_u[user] @ user_embed
    fp = L_i[pos_item] @ item_embed
    fn = L_i[nega_item] @ item_embed
    res_nega = jnp.sum(fu * fn, axis=1)
    nega_weight = 1.0 - jnp.log10(1.0 - jnp.minimum(jax.nn.sigmoid(res_nega), 0.99))
    out = jax.nn.sigmoid(jnp.sum(fu * fp, axis=1) - nega_weight * res_nega)
    reg_term = reg * jnp.sum(fu ** 2 + fp ** 2 + fn ** 2)
    return (-jnp.sum(jnp.log(out)) + reg_term) / divisor


def _make_case(seed, user_size, item_size, latent_size, feat_size, B):
    """Deterministic synthetic stand-in for the .npy precompute of __init__."""
    key = jax.random.PRNGKey(seed)
    ks = jax.random.split(key, 8)

    ue_std = jnp.sqrt(2.0 / (user_size + latent_size))   # xavier_normal_
    ie_std = jnp.sqrt(2.0 / (item_size + latent_size))
    user_embed = jax.random.normal(ks[0], (user_size, latent_size), jnp.float32) * ue_std
    item_embed = jax.random.normal(ks[1], (item_size, latent_size), jnp.float32) * ie_std

    user_values = jax.random.uniform(ks[2], (feat_size,), jnp.float32) * 0.3
    item_values = jax.random.uniform(ks[3], (feat_size,), jnp.float32) * 0.3
    user_vector = jax.random.normal(ks[4], (user_size, feat_size), jnp.float32) * 0.1
    item_vector = jax.random.normal(ks[5], (item_size, feat_size), jnp.float32) * 0.1

    # __init__ precompute: filter = exp(beta * values); L = (V * filter) @ V.T
    L_u = (user_vector * jnp.exp(BETA * user_values)) @ user_vector.T
    L_i = (item_vector * jnp.exp(BETA * item_values)) @ item_vector.T

    user = jax.random.randint(ks[6], (B,), 0, user_size)
    pi_ni = jax.random.randint(ks[7], (2, B), 0, item_size)
    return L_u, L_i, user_embed, item_embed, user, pi_ni[0], pi_ni[1]


if __name__ == "__main__":
    # Case 1: small symmetric-ish shapes (single K tile).
    c1 = _make_case(0, user_size=12, item_size=20, latent_size=32, feat_size=6, B=8)
    L_u, L_i, ue, ie, user, pos_item, nega_item = c1
    prep = gde_prepare(L_u, L_i, ue, ie, max_batch=user.shape[0])
    loss = jax.block_until_ready(gde_forward(prep, user, pos_item, nega_item))
    ref = gde_forward_ref(L_u, L_i, ue, ie, user, pos_item, nega_item)
    assert jnp.isfinite(loss), "kernel produced non-finite loss"
    assert jnp.allclose(loss, ref, rtol=2e-2, atol=2e-3), (loss, ref)

    # Case 2: U != I with a small K tile so the per-side tile counts differ
    # (exercises the clamped index_maps and the @pl.when zero-tile skip).
    c2 = _make_case(1, user_size=72, item_size=200, latent_size=48, feat_size=10, B=24)
    L_u2, L_i2, ue2, ie2, user2, pos2, nega2 = c2
    prep2 = gde_prepare(L_u2, L_i2, ue2, ie2, tk=128, max_batch=user2.shape[0])
    loss2 = jax.block_until_ready(gde_forward(prep2, user2, pos2, nega2))
    ref2 = gde_forward_ref(L_u2, L_i2, ue2, ie2, user2, pos2, nega2)
    assert jnp.isfinite(loss2), "kernel produced non-finite loss (case 2)"
    assert jnp.allclose(loss2, ref2, rtol=2e-2, atol=2e-3), (loss2, ref2)

    print("KERNEL_OK")
</pallas_src>

<mosaic_0001>
module attributes {stable_mosaic.version = 11 : i64} {
  func.func @_gde_loss_kernel(%arg0: i32, %arg1: memref<16x128xbf16, #tpu.memory_space<vmem>>, %arg2: memref<128x128xbf16, #tpu.memory_space<vmem>>, %arg3: memref<32x128xbf16, #tpu.memory_space<vmem>>, %arg4: memref<128x128xbf16, #tpu.memory_space<vmem>>, %arg5: memref<1x1xf32, #tpu.memory_space<smem>>, %arg6: memref<16x128xf32, #tpu.memory_space<vmem>>, %arg7: memref<32x128xf32, #tpu.memory_space<vmem>>) attributes {dimension_semantics = [#tpu.dimension_semantics<arbitrary>], iteration_bounds = array<i64: 1>, scalar_prefetch = 0 : i64, scratch_operands = 2 : i64, tpu.core_type = #tpu.core_type<tc>, window_params = [{transform_indices = @transform_0, window_bounds = array<i64: 16, 128>}, {transform_indices = @transform_1, window_bounds = array<i64: 128, 128>}, {transform_indices = @transform_2, window_bounds = array<i64: 32, 128>}, {transform_indices = @transform_3, window_bounds = array<i64: 128, 128>}, {transform_indices = @transform_4, window_bounds = array<i64: 1, 1>}]} {
    %c0_i32 = arith.constant 0 : i32
    %0 = arith.cmpi eq, %arg0, %c0_i32 : i32
    %1 = arith.extui %0 : i1 to i32
    %c0_i32_0 = arith.constant 0 : i32
    %2 = arith.cmpi ne, %1, %c0_i32_0 : i32
    scf.if %2 {
      %cst = arith.constant 0.000000e+00 : f32
      %12 = vector.broadcast %cst : f32 to vector<16x128xf32>
      %c0 = arith.constant 0 : index
      %c0_6 = arith.constant 0 : index
      %13 = vector.load %arg6[%c0, %c0_6] : memref<16x128xf32, #tpu.memory_space<vmem>>, vector<16x128xf32>
      tpu.vector_store %arg6[%c0, %c0_6], %12 {strides = array<i32>} : memref<16x128xf32, #tpu.memory_space<vmem>>, vector<16x128xf32>,
      %cst_7 = arith.constant 0.000000e+00 : f32
      %14 = vector.broadcast %cst_7 : f32 to vector<32x128xf32>
      %c0_8 = arith.constant 0 : index
      %c0_9 = arith.constant 0 : index
      %15 = vector.load %arg7[%c0_8, %c0_9] : memref<32x128xf32, #tpu.memory_space<vmem>>, vector<32x128xf32>
      tpu.vector_store %arg7[%c0_8, %c0_9], %14 {strides = array<i32>} : memref<32x128xf32, #tpu.memory_space<vmem>>, vector<32x128xf32>,
    } else {
    }
    %c1_i32 = arith.constant 1 : i32
    %3 = arith.cmpi slt, %arg0, %c1_i32 : i32
    %4 = arith.extui %3 : i1 to i32
    %c0_i32_1 = arith.constant 0 : i32
    %5 = arith.cmpi ne, %4, %c0_i32_1 : i32
    scf.if %5 {
      %c0 = arith.constant 0 : index
      %c0_6 = arith.constant 0 : index
      %12 = vector.load %arg6[%c0, %c0_6] : memref<16x128xf32, #tpu.memory_space<vmem>>, vector<16x128xf32>
      %c0_7 = arith.constant 0 : index
      %c0_8 = arith.constant 0 : index
      %13 = vector.load %arg1[%c0_7, %c0_8] : memref<16x128xbf16, #tpu.memory_space<vmem>>, vector<16x128xbf16>
      %c0_9 = arith.constant 0 : index
      %c0_10 = arith.constant 0 : index
      %14 = vector.load %arg2[%c0_9, %c0_10] : memref<128x128xbf16, #tpu.memory_space<vmem>>, vector<128x128xbf16>
      %cst = arith.constant dense<0.000000e+00> : vector<16x128xf32>
      %15 = tpu.matmul %13, %14, %cst {dimension_numbers = #tpu.dot_dimension_numbers<[1], [0], [0], [1], [0, 0, 1, 1], [], []>} : vector<16x128xbf16>, vector<128x128xbf16>, vector<16x128xf32> -> vector<16x128xf32>
      %16 = arith.addf %12, %15 : vector<16x128xf32>
      %c0_11 = arith.constant 0 : index
      %c0_12 = arith.constant 0 : index
      %17 = vector.load %arg6[%c0_11, %c0_12] : memref<16x128xf32, #tpu.memory_space<vmem>>, vector<16x128xf32>
      tpu.vector_store %arg6[%c0_11, %c0_12], %16 {strides = array<i32>} : memref<16x128xf32, #tpu.memory_space<vmem>>, vector<16x128xf32>,
    } else {
    }
    %c1_i32_2 = arith.constant 1 : i32
    %6 = arith.cmpi slt, %arg0, %c1_i32_2 : i32
    %7 = arith.extui %6 : i1 to i32
    %c0_i32_3 = arith.constant 0 : i32
    %8 = arith.cmpi ne, %7, %c0_i32_3 : i32
    scf.if %8 {
      %c0 = arith.constant 0 : index
      %c0_6 = arith.constant 0 : index
      %12 = vector.load %arg7[%c0, %c0_6] : memref<32x128xf32, #tpu.memory_space<vmem>>, vector<32x128xf32>
      %c0_7 = arith.constant 0 : index
      %c0_8 = arith.constant 0 : index
      %13 = vector.load %arg3[%c0_7, %c0_8] : memref<32x128xbf16, #tpu.memory_space<vmem>>, vector<32x128xbf16>
      %c0_9 = arith.constant 0 : index
      %c0_10 = arith.constant 0 : index
      %14 = vector.load %arg4[%c0_9, %c0_10] : memref<128x128xbf16, #tpu.memory_space<vmem>>, vector<128x128xbf16>
      %cst = arith.constant dense<0.000000e+00> : vector<32x128xf32>
      %15 = tpu.matmul %13, %14, %cst {dimension_numbers = #tpu.dot_dimension_numbers<[1], [0], [0], [1], [0, 0, 1, 1], [], []>} : vector<32x128xbf16>, vector<128x128xbf16>, vector<32x128xf32> -> vector<32x128xf32>
      %16 = arith.addf %12, %15 : vector<32x128xf32>
      %c0_11 = arith.constant 0 : index
      %c0_12 = arith.constant 0 : index
      %17 = vector.load %arg7[%c0_11, %c0_12] : memref<32x128xf32, #tpu.memory_space<vmem>>, vector<32x128xf32>
      tpu.vector_store %arg7[%c0_11, %c0_12], %16 {strides = array<i32>} : memref<32x128xf32, #tpu.memory_space<vmem>>, vector<32x128xf32>,
    } else {
    }
    %c0_i32_4 = arith.constant 0 : i32
    %9 = arith.cmpi eq, %arg0, %c0_i32_4 : i32
    %10 = arith.extui %9 : i1 to i32
    %c0_i32_5 = arith.constant 0 : i32
    %11 = arith.cmpi ne, %10, %c0_i32_5 : i32
    scf.if %11 {
      %c0 = arith.constant 0 : index
      %c0_6 = arith.constant 0 : index
      %12 = vector.load %arg6[%c0, %c0_6] : memref<16x128xf32, #tpu.memory_space<vmem>>, vector<16x128xf32>
      %c0_7 = arith.constant 0 : index
      %c0_8 = arith.constant 0 : index
      %13 = vector.load %arg7[%c0_7, %c0_8] : memref<32x128xf32, #tpu.memory_space<vmem>>, vector<16x128xf32>
      %c16 = arith.constant 16 : index
      %c0_9 = arith.constant 0 : index
      %14 = vector.load %arg7[%c16, %c0_9] : memref<32x128xf32, #tpu.memory_space<vmem>>, vector<16x128xf32>
      %15 = arith.mulf %12, %14 : vector<16x128xf32>
      %cst = arith.constant dense<0.000000e+00> : vector<16xf32>
      %16 = vector.multi_reduction <add>, %15, %cst [1] : vector<16x128xf32> to vector<16xf32>
      %17 = vector.shape_cast %16 : vector<16xf32> to vector<16x1xf32>
      %18 = arith.mulf %12, %13 : vector<16x128xf32>
      %cst_10 = arith.constant dense<0.000000e+00> : vector<16xf32>
      %19 = vector.multi_reduction <add>, %18, %cst_10 [1] : vector<16x128xf32> to vector<16xf32>
      %20 = vector.shape_cast %19 : vector<16xf32> to vector<16x1xf32>
      %21 = arith.negf %17 : vector<16x1xf32>
      %22 = math.exp %21 : vector<16x1xf32>
      %cst_11 = arith.constant 1.000000e+00 : f32
      %23 = vector.broadcast %cst_11 : f32 to vector<16x1xf32>
      %24 = arith.addf %23, %22 : vector<16x1xf32>
      %25 = arith.divf %23, %24 : vector<16x1xf32>
      %cst_12 = arith.constant 9.900000e-01 : f32
      %26 = vector.broadcast %cst_12 : f32 to vector<16x1xf32>
      %27 = arith.minimumf %25, %26 : vector<16x1xf32>
      %cst_13 = arith.constant 1.000000e+00 : f32
      %28 = vector.broadcast %cst_13 : f32 to vector<16x1xf32>
      %29 = arith.subf %28, %27 : vector<16x1xf32>
      %30 = math.log %29 : vector<16x1xf32>
      %cst_14 = arith.constant 0.434294492 : f32
      %31 = vector.broadcast %cst_14 : f32 to vector<16x1xf32>
      %32 = arith.mulf %30, %31 : vector<16x1xf32>
      %cst_15 = arith.constant 1.000000e+00 : f32
      %33 = vector.broadcast %cst_15 : f32 to vector<16x1xf32>
      %34 = arith.subf %33, %32 : vector<16x1xf32>
      %35 = arith.mulf %34, %17 : vector<16x1xf32>
      %36 = arith.subf %20, %35 : vector<16x1xf32>
      %cst_16 = arith.constant 0.000000e+00 : f32
      %37 = vector.broadcast %cst_16 : f32 to vector<16x1xf32>
      %38 = arith.subf %37, %36 : vector<16x1xf32>
      %cst_17 = arith.constant 0.000000e+00 : f32
      %39 = vector.broadcast %cst_17 : f32 to vector<16x1xf32>
      %40 = arith.maximumf %38, %39 : vector<16x1xf32>
      %41 = math.absf %36 : vector<16x1xf32>
      %cst_18 = arith.constant 0.000000e+00 : f32
      %42 = vector.broadcast %cst_18 : f32 to vector<16x1xf32>
      %43 = arith.subf %42, %41 : vector<16x1xf32>
      %44 = math.exp %43 : vector<16x1xf32>
      %45 = math.log1p %44 : vector<16x1xf32>
      %46 = arith.addf %40, %45 : vector<16x1xf32>
      %47 = tpu.iota {dimensions = array<i32: 0>} : vector<16x1xi32>
      %c8_i32 = arith.constant 8 : i32
      %48 = vector.broadcast %c8_i32 : i32 to vector<16x1xi32>
      %49 = arith.cmpi slt, %47, %48 : vector<16x1xi32>
      %50 = arith.extui %49 : vector<16x1xi1> to vector<16x1xi32>
      %51 = arith.sitofp %50 : vector<16x1xi32> to vector<16x1xf32>
      %52 = arith.mulf %46, %51 : vector<16x1xf32>
      %53 = vector.shape_cast %52 : vector<16x1xf32> to vector<1x16x1xf32>
      %cst_19 = arith.constant dense<0.000000e+00> : vector<1xf32>
      %54 = vector.multi_reduction <add>, %53, %cst_19 [1, 2] : vector<1x16x1xf32> to vector<1xf32>
      %55 = vector.shape_cast %54 : vector<1xf32> to vector<1x1x1xf32>
      %56 = vector.extract %55[0, 0, 0] : f32 from vector<1x1x1xf32>
      %57 = arith.mulf %12, %12 : vector<16x128xf32>
      %58 = arith.mulf %13, %13 : vector<16x128xf32>
      %59 = arith.addf %57, %58 : vector<16x128xf32>
      %60 = arith.mulf %14, %14 : vector<16x128xf32>
      %61 = arith.addf %59, %60 : vector<16x128xf32>
      %cst_20 = arith.constant dense<0.000000e+00> : vector<16xf32>
      %62 = vector.multi_reduction <add>, %61, %cst_20 [1] : vector<16x128xf32> to vector<16xf32>
      %63 = vector.shape_cast %62 : vector<16xf32> to vector<16x1xf32>
      %64 = arith.mulf %63, %51 : vector<16x1xf32>
      %65 = vector.shape_cast %64 : vector<16x1xf32> to vector<1x16x1xf32>
      %cst_21 = arith.constant dense<0.000000e+00> : vector<1xf32>
      %66 = vector.multi_reduction <add>, %65, %cst_21 [1, 2] : vector<1x16x1xf32> to vector<1xf32>
      %67 = vector.shape_cast %66 : vector<1xf32> to vector<1x1x1xf32>
      %68 = vector.extract %67[0, 0, 0] : f32 from vector<1x1x1xf32>
      %cst_22 = arith.constant 0.00999999977 : f32
      %69 = arith.mulf %cst_22, %68 : f32
      %70 = arith.addf %56, %69 : f32
      %cst_23 = arith.constant 2.560000e+02 : f32
      %71 = arith.divf %70, %cst_23 : f32
      %c0_24 = arith.constant 0 : index
      %c0_25 = arith.constant 0 : index
      %72 = memref.load %arg5[%c0_24, %c0_25] : memref<1x1xf32, #tpu.memory_space<smem>>
      memref.store %71, %arg5[%c0_24, %c0_25] : memref<1x1xf32, #tpu.memory_space<smem>>
    } else {
    }
    return
  }
  func.func @transform_0(%arg0: i32) -> (i32, i32) {
    %c0_i32 = arith.constant 0 : i32
    %0 = arith.minsi %arg0, %c0_i32 : i32
    %c0_i32_0 = arith.constant 0 : i32
    %c0_i32_1 = arith.constant 0 : i32
    return %c0_i32_0, %0 : i32, i32
  }
  func.func @transform_1(%arg0: i32) -> (i32, i32) {
    %c0_i32 = arith.constant 0 : i32
    %0 = arith.minsi %arg0, %c0_i32 : i32
    %c0_i32_0 = arith.constant 0 : i32
    %c0_i32_1 = arith.constant 0 : i32
    return %0, %c0_i32_0 : i32, i32
  }
  func.func @transform_2(%arg0: i32) -> (i32, i32) {
    %c0_i32 = arith.constant 0 : i32
    %0 = arith.minsi %arg0, %c0_i32 : i32
    %c0_i32_0 = arith.constant 0 : i32
    %c0_i32_1 = arith.constant 0 : i32
    return %c0_i32_0, %0 : i32, i32
  }
  func.func @transform_3(%arg0: i32) -> (i32, i32) {
    %c0_i32 = arith.constant 0 : i32
    %0 = arith.minsi %arg0, %c0_i32 : i32
    %c0_i32_0 = arith.constant 0 : i32
    %c0_i32_1 = arith.constant 0 : i32
    return %0, %c0_i32_0 : i32, i32
  }
  func.func @transform_4(%arg0: i32) -> (i32, i32) {
    %c0_i32 = arith.constant 0 : i32
    %c0_i32_0 = arith.constant 0 : i32
    %c0_i32_1 = arith.constant 0 : i32
    return %c0_i32, %c0_i32_0 : i32, i32
  }
}

</mosaic_0001>

<bundles_post_ra>
// kernel: tpu_custom_call.1
= control target key start
LH: loop header
LB: loop body
LE: loop exit
PB: predicated region body
PF: predicated region fallthrough
CT: control target
= control target key end

     0   :  { %9 = vsyncpa [#allocation5], 0  ;;  %s801_s0 = inlined_call_operand.hbm [shape: bf16[16,128], index: 0, kind: input, shape index: {}]   ;;  %s802_s1 = inlined_call_operand.hbm [shape: bf16[128,128], index: 1, kind: input, shape index: {}]   ;;  %s803_s2 = inlined_call_operand.hbm [shape: bf16[32,128], index: 2, kind: input, shape index: {}]   ;;  %s804_s3 = inlined_call_operand.hbm [shape: bf16[128,128], index: 3, kind: input, shape index: {}]   ;;  %s805_s4 = inlined_call_operand.hbm [shape: f32[1,1], index: 4, kind: output, shape index: {}]  }
   0x1   :  { %10 = vsyncpa [#allocation8], 0 }
   0x2   :  { %11 = vsyncpa [#allocation11], 0 }
   0x3   :  { %12 = vsyncpa [#allocation6], 0  ;;  %s30_s17 = sshll.u32 %s802_s1, 4  ;;  %s745_s18 = smov [#allocation7]   ;;  %s31_s17 = int_to_ptr.hbm [resolvable:$true] %s30_s17 }
   0x4   :  { %s32_s19 = sshll.u32 %s745_s18, 4  ;;  %s17_s22 = sshll.u32 %s801_s0, 4  ;;  %s33_s19 = int_to_ptr.vmem [resolvable:$true] %s32_s19  ;;  %s18_s22 = int_to_ptr.hbm [resolvable:$true] %s17_s22 }
   0x5   :  { %s746_s23 = smov 64   ;;  %s747_s24 = smov 4  }
   0x6   :  { %38 = dma.hbm_to_vmem [thread:$0]  %s31_s17, 1024, %s33_s19, [#allocation8], %s746_s23, %s746_s23, %s747_s24  }
   0x7   :  { %s748_s25 = smov [#allocation4]   ;;  %s43_s29 = sshll.u32 %s803_s2, 4  ;;  %s44_s29 = int_to_ptr.hbm [resolvable:$true] %s43_s29 }
   0x8   :  { %s19_s26 = sshll.u32 %s748_s25, 4  ;;  %s56_s5 = sshll.u32 %s804_s3, 4  ;;  %s20_s26 = int_to_ptr.vmem [resolvable:$true] %s19_s26  ;;  %s57_s5 = int_to_ptr.hbm [resolvable:$true] %s56_s5 }
   0x9   :  { %25 = dma.hbm_to_vmem [thread:$0]  %s18_s22, 128, %s20_s26, [#allocation5], %s746_s23, %s746_s23, %s747_s24  }
   0xa   :  { %s749_s6 = smov [#allocation9]   ;;  %s750_s0 = smov [#allocation10]  }
   0xb   :  { %s45_s7 = sshll.u32 %s749_s6, 4  ;;  %s58_s8 = sshll.u32 %s750_s0, 4  ;;  %s46_s7 = int_to_ptr.vmem [resolvable:$true] %s45_s7  ;;  %s59_s8 = int_to_ptr.vmem [resolvable:$true] %s58_s8 }
   0xc   :  { %51 = dma.hbm_to_vmem [thread:$0]  %s44_s29, 256, %s46_s7, [#allocation8], %s746_s23, %s746_s23, %s747_s24  }
   0xd   :  { %64 = dma.hbm_to_vmem [thread:$0]  %s57_s5, 1024, %s59_s8, [#allocation11], %s746_s23, %s746_s23, %s747_s24  }
   0xe   :  { %737 = dma.done.wait [#allocation5], 128  }
   0xf   :  { %738 = vsyncadd [#allocation5], 4294967168 }
  0x10   :  { %739 = dma.done.wait [#allocation8], 1280  }
  0x11   :  { %740 = vsyncadd [#allocation8], 4294966016 }
  0x12   :  { %741 = dma.done.wait [#allocation11], 1024  }
  0x13   :  { %742 = vsyncadd [#allocation11], 4294966272  ;;  %v574_v0 = vld [vmem:[#allocation7 + $0x38] sm:$0xff]  ;;  %v584_v1 = vld [vmem:[#allocation10 + $0x38] sm:$0xff]  ;;  %vm416_vm0 = vcmask 7168   ;;  %s475_s12 = sshll.u32 %s805_s4, 4  ;;  %s476_s12 = int_to_ptr.hbm [resolvable:$true] %s475_s12 }
  0x14   :  { %169 = vmatpush.bf16.msra.mxu0 %v574_v0  ;;  %271 = vmatpush.bf16.msra.mxu1 %v584_v1  ;;  %v573_v2 = vld [vmem:[#allocation7 + $0x30] sm:$0xff]  ;;  %v583_v3 = vld [vmem:[#allocation10 + $0x30] sm:$0xff]  ;;  %v572_v4 = vld [vmem:[#allocation7 + $0x28] sm:$0xff]  ;;  %s752_s16 = smov [#allocation12]  }
  0x15   :  { %585 = vmatpush.bf16.msra.mxu2 %v584_v1  ;;  %v582_v5 = vld [vmem:[#allocation10 + $0x28] sm:$0xff]  ;;  %v571_v6 = vld [vmem:[#allocation7 + $0x20] sm:$0xff]  ;;  %v581_v7 = vld [vmem:[#allocation10 + $0x20] sm:$0xff] }
  0x16   :  { %v570_v8 = vld [vmem:[#allocation7 + $0x18] sm:$0xff]  ;;  %v580_v9 = vld [vmem:[#allocation10 + $0x18] sm:$0xff]  ;;  %v569_v10 = vld [vmem:[#allocation7 + $0x10] sm:$0xff] }
  0x17   :  { %v579_v11 = vld [vmem:[#allocation10 + $0x10] sm:$0xff]  ;;  %v568_v12 = vld [vmem:[#allocation7 + $0x8] sm:$0xff]  ;;  %v578_v13 = vld [vmem:[#allocation10 + $0x8] sm:$0xff] }
  0x18   :  { %170 = vmatpush.bf16.msra.mxu0 %v573_v2  ;;  %272 = vmatpush.bf16.msra.mxu1 %v583_v3  ;;  %v567_v14 = vld [vmem:[#allocation7] sm:$0xff]  ;;  %v577_v15 = vld [vmem:[#allocation10] sm:$0xff]  ;;  %v566_v16 = vld [vmem:[#allocation4] sm:$0xff] }
  0x19   :  { %586 = vmatpush.bf16.msra.mxu2 %v583_v3  ;;  %v575_v17 = vld [vmem:[#allocation9] sm:$0xff]  ;;  %v576_v18 = vld [vmem:[#allocation9 + $0x8] sm:$0xff] }
  0x1c   :  { %171 = vmatpush.bf16.msra.mxu0 %v572_v4  ;;  %273 = vmatpush.bf16.msra.mxu1 %v582_v5 }
  0x1d   :  { %587 = vmatpush.bf16.msra.mxu2 %v582_v5 }
  0x20   :  { %172 = vmatpush.bf16.msra.mxu0 %v571_v6  ;;  %274 = vmatpush.bf16.msra.mxu1 %v581_v7 }
  0x21   :  { %588 = vmatpush.bf16.msra.mxu2 %v581_v7 }
  0x24   :  { %173 = vmatpush.bf16.msra.mxu0 %v570_v8  ;;  %275 = vmatpush.bf16.msra.mxu1 %v580_v9 }
  0x25   :  { %589 = vmatpush.bf16.msra.mxu2 %v580_v9 }
  0x28   :  { %174 = vmatpush.bf16.msra.mxu0 %v569_v10  ;;  %276 = vmatpush.bf16.msra.mxu1 %v579_v11 }
  0x29   :  { %590 = vmatpush.bf16.msra.mxu2 %v579_v11 }
  0x2c   :  { %175 = vmatpush.bf16.msra.mxu0 %v568_v12  ;;  %277 = vmatpush.bf16.msra.mxu1 %v578_v13 }
  0x2d   :  { %591 = vmatpush.bf16.msra.mxu2 %v578_v13 }
  0x30   :  { %176 = vmatpush.bf16.msra.mxu0 %v567_v14  ;;  %278 = vmatpush.bf16.msra.mxu1 %v577_v15 }
  0x31   :  { %592 = vmatpush.bf16.msra.mxu2 %v577_v15 }
  0x33   :  { %177 = vmatmul.bf16.vlgmr.msra.gmra.mxu0 %v566_v16  ;;  %279 = vmatmul.bf16.vlgmr.msra.gmra.mxu1 %v575_v17 }
  0x34   :  { %284 = vmatmul.bf16.vlgmr.msra.gmra.mxu2 %v576_v18 }
  0xb0   :  { %v178_v19 = vpop.f32.mrf.mxu0  ;;  %v280_v20 = vpop.f32.mrf.mxu1 }
  0xb1   :  { %v313_v31 = vmul.f32 %v280_v20, %v178_v19  ;;  %v429_v32 = vmul.f32 %v178_v19, %v178_v19  ;;  %v431_v33 = vmul.f32 %v280_v20, %v280_v20 }
  0xb3   :  { %v433_v36 = vadd.f32 %v431_v33, %v429_v32 }
  0xb7   :  { %v285_v21 = vpop.f32.mrf.mxu2 }
  0xb8   :  { %v180_v22 = vpop.f32.mrf.mxu0  ;;  %v282_v23 = vpop.f32.mrf.mxu1  ;;  %v435_v35 = vmul.f32 %v285_v21, %v285_v21  ;;  %v307_v37 = vmul.f32 %v285_v21, %v178_v19 }
  0xb9   :  { %v314_v24 = vmul.f32 %v282_v23, %v180_v22  ;;  %v430_v25 = vmul.f32 %v180_v22, %v180_v22  ;;  %v432_v26 = vmul.f32 %v282_v23, %v282_v23 }
  0xba   :  { %v437_v38 = vadd.f32 %v435_v35, %v433_v36 }
  0xbb   :  { %317 = vadd.xlane.f32.xlu1 %v314_v24  ;;  %v434_v30 = vadd.f32 %v432_v26, %v430_v25 }
  0xbf   :  { %v287_v27 = vpop.f32.mrf.mxu2 }
  0xc0   :  { %v436_v28 = vmul.f32 %v287_v27, %v287_v27  ;;  %v308_v29 = vmul.f32 %v287_v27, %v180_v22 }
  0xc2   :  { %311 = vadd.xlane.f32.xlu0 %v308_v29  ;;  %v438_v34 = vadd.f32 %v436_v28, %v434_v30 }
  0xc3   :  { %315 = vadd.xlane.f32.xlu1 %v313_v31 }
  0xc4   :  { %441 = vadd.xlane.f32.xlu2 %v438_v34 }
  0xca   :  { %309 = vadd.xlane.f32.xlu0 %v307_v37 }
  0xcc   :  { %439 = vadd.xlane.f32.xlu2 %v437_v38 }
 0x12e   :  { %v318_v17 = vpop.xlane.xlu1 %317 }
 0x135   :  { %v312_v39 = vpop.xlane.xlu0 %311 }
 0x136   :  { %v565_v40 = vmul.f32 -1.442695, %v312_v39  ;;  %v316_v28 = vpop.xlane.xlu1 %315 }
 0x137   :  { %v442_v41 = vpop.xlane.xlu2 %441 }
 0x138   :  { %607 = vpow2.f32 %v565_v40  ;;  %v444_v42 = vmul.f32 0.0, %v442_v41 }
 0x13a   :  { %v446_v49 = vsel %vm416_vm0, %v444_v42, 0.0 }
 0x13d   :  { %v790_v43 = vpop.xlane.xlu0 %309 }
 0x13e   :  { %v608_v44 = vpop.eup %607  ;;  %v564_v45 = vmul.f32 -1.442695, %v790_v43 }
 0x13f   :  { %v326_v46 = vadd.f32 1.0, %v608_v44  ;;  %v440_v47 = vpop.xlane.xlu2 %439 }
 0x140   :  { %609 = vpow2.f32 %v564_v45  ;;  %v445_v48 = vsel %vm416_vm0, %v440_v47, 0.0 }
 0x141   :  { %611 = vrcp.f32 %v326_v46  ;;  %v447_v50 = vadd.f32 %v446_v49, %v445_v48  ;;  %v353_v56 = vand.u32 2147483648, %v326_v46  ;;  %v351_v58 = vand.u32 2147483647, %v326_v46 }
 0x142   :  { %vm347_vm2 = vweird.f32 %v326_v46 }
 0x143   :  { %448 = vadd.xlane.f32.xlu1 %v447_v50  ;;  %v354_v61 = vor.u32 1.1754944e-38, %v353_v56  ;;  %vm352_vm4 = vcmp.eq.f32.partialorder %v351_v58, 8.507059e+37 }
 0x146   :  { %v610_v51 = vpop.eup %609 }
 0x147   :  { %v612_v52 = vpop.eup %611  ;;  %v325_v53 = vadd.f32 1.0, %v610_v51 }
 0x148   :  { %v343_v54 = vmul.f32 %v612_v52, %v326_v46  ;;  %vm348_vm1 = vweird.f32 %v612_v52 }
 0x149   :  { %613 = vrcp.f32 %v325_v53  ;;  %vm349_vm3 = vmor %vm347_vm2, %vm348_vm1  ;;  %v338_v3 = vand.u32 2147483648, %v325_v53  ;;  %v336_v6 = vand.u32 2147483647, %v325_v53  ;;  %vm332_vm6 = vweird.f32 %v325_v53 }
 0x14a   :  { %v344_v55 = vsub.f32 1.0, %v343_v54 }
 0x14b   :  { %v339_v8 = vor.u32 1.1754944e-38, %v338_v3  ;;  %vm337_vm8 = vcmp.eq.f32.partialorder %v336_v6, 8.507059e+37 }
 0x14c   :  { %v345_v57 = vmul.f32 %v612_v52, %v344_v55 }
 0x14e   :  { %v346_v59 = vadd.f32 %v612_v52, %v345_v57 }
 0x14f   :  { %v614_v60 = vpop.eup %613 }
 0x150   :  { %v350_v62 = vsel %vm349_vm3, %v612_v52, %v346_v59  ;;  %v328_v63 = vmul.f32 %v614_v60, %v325_v53  ;;  %vm333_vm5 = vweird.f32 %v614_v60 }
 0x151   :  { %v355_v0 = vsel %vm352_vm4, %v354_v61, %v350_v62  ;;  %vm334_vm7 = vmor %vm332_vm6, %vm333_vm5  ;;  %v751_v61 = vmov 256.0  }
 0x152   :  { %v358_v1 = vmin.f32 %v355_v0, 0.99  ;;  %v329_v2 = vsub.f32 1.0, %v328_v63 }
 0x154   :  { %v360_v4 = vsub.f32 1.0, %v358_v1  ;;  %v330_v5 = vmul.f32 %v614_v60, %v329_v2 }
 0x156   :  { %615 = vlog2.f32 %v360_v4  ;;  %v331_v7 = vadd.f32 %v614_v60, %v330_v5 }
 0x158   :  { %v335_v9 = vsel %vm334_vm7, %v614_v60, %v331_v7 }
 0x159   :  { %v340_v10 = vsel %vm337_vm8, %v339_v8, %v335_v9 }
 0x15a   :  { %v357_v11 = vmin.f32 %v340_v10, 0.99 }
 0x15c   :  { %v616_v12 = vpop.eup %615  ;;  %v359_v13 = vsub.f32 1.0, %v357_v11 }
 0x15d   :  { %v364_v14 = vmul.f32 0.6931472, %v616_v12 }
 0x15e   :  { %617 = vlog2.f32 %v359_v13 }
 0x15f   :  { %v366_v15 = vmul.f32 0.4342945, %v364_v14 }
 0x161   :  { %v368_v16 = vsub.f32 1.0, %v366_v15 }
 0x163   :  { %v370_v18 = vmul.f32 %v368_v16, %v312_v39 }
 0x164   :  { %v618_v19 = vpop.eup %617 }
 0x165   :  { %v372_v20 = vsub.f32 %v318_v17, %v370_v18  ;;  %v362_v21 = vmul.f32 0.6931472, %v618_v19 }
 0x167   :  { %v378_v22 = vand.u32 2147483647, %v372_v20  ;;  %v365_v23 = vmul.f32 0.4342945, %v362_v21  ;;  %v374_v40 = vsub.f32 0.0, %v372_v20 }
 0x169   :  { %v380_v24 = vsub.f32 0.0, %v378_v22  ;;  %v367_v25 = vsub.f32 1.0, %v365_v23  ;;  %v376_v46 = vmax.f32 %v374_v40, 0.0 }
 0x16b   :  { %v383_v26 = vmul.f32 1.442695, %v380_v24  ;;  %v369_v27 = vmul.f32 %v367_v25, %v790_v43 }
 0x16d   :  { %619 = vpow2.f32 %v383_v26  ;;  %v371_v29 = vsub.f32 %v316_v28, %v369_v27 }
 0x16f   :  { %v377_v30 = vand.u32 2147483647, %v371_v29  ;;  %v373_v48 = vsub.f32 0.0, %v371_v29 }
 0x171   :  { %v379_v31 = vsub.f32 0.0, %v377_v30  ;;  %v375_v54 = vmax.f32 %v373_v48, 0.0 }
 0x173   :  { %v620_v32 = vpop.eup %619  ;;  %v381_v33 = vmul.f32 1.442695, %v379_v31 }
 0x174   :  { %v394_v34 = vadd.f32 1.0, %v620_v32  ;;  %v397_v35 = vmul.f32 -0.5, %v620_v32  ;;  %v400_v37 = vand.u32 2147483647, %v620_v32 }
 0x175   :  { %621 = vpow2.f32 %v381_v33 }
 0x176   :  { %623 = vlog2.f32 %v394_v34  ;;  %v398_v36 = vadd.f32 1.0, %v397_v35  ;;  %vm401_vm9 = vcmp.lt.f32.partialorder %v400_v37, 0.0004427343 }
 0x178   :  { %v399_v43 = vmul.f32 %v620_v32, %v398_v36 }
 0x17b   :  { %v622_v38 = vpop.eup %621 }
 0x17c   :  { %v624_v39 = vpop.eup %623  ;;  %v385_v41 = vadd.f32 1.0, %v622_v38  ;;  %v388_v42 = vmul.f32 -0.5, %v622_v38  ;;  %v391_v49 = vand.u32 2147483647, %v622_v38 }
 0x17d   :  { %v396_v44 = vmul.f32 0.6931472, %v624_v39 }
 0x17e   :  { %625 = vlog2.f32 %v385_v41  ;;  %v389_v47 = vadd.f32 1.0, %v388_v42  ;;  %vm392_vm10 = vcmp.lt.f32.partialorder %v391_v49, 0.0004427343 }
 0x17f   :  { %v402_v45 = vsel %vm401_vm9, %v399_v43, %v396_v44  ;;  %627 = vrcp.f32 %v751_v61 }
 0x180   :  { %v404_v50 = vadd.f32 %v402_v45, %v376_v46  ;;  %v390_v53 = vmul.f32 %v622_v38, %v389_v47 }
 0x182   :  { %v415_v55 = vmul.f32 0.0, %v404_v50 }
 0x184   :  { %v626_v51 = vpop.eup %625  ;;  %v418_v59 = vsel %vm416_vm0, %v415_v55, 0.0 }
 0x185   :  { %v387_v52 = vmul.f32 0.6931472, %v626_v51  ;;  %v628_v0 = vpop.eup %627 }
 0x186   :  { %v460_v2 = vmul.f32 256.0, %v628_v0  ;;  %vm464_vm11 = vweird.f32 %v628_v0 }
 0x187   :  { %v393_v56 = vsel %vm392_vm10, %v390_v53, %v387_v52 }
 0x188   :  { %v403_v57 = vadd.f32 %v393_v56, %v375_v54  ;;  %v461_v5 = vsub.f32 1.0, %v460_v2 }
 0x18a   :  { %v417_v58 = vsel %vm416_vm0, %v403_v57, 0.0  ;;  %v462_v9 = vmul.f32 %v628_v0, %v461_v5 }
 0x18b   :  { %v419_v60 = vadd.f32 %v418_v59, %v417_v58 }
 0x18c   :  { %v463_v13 = vadd.f32 %v628_v0, %v462_v9 }
 0x18d   :  { %420 = vadd.xlane.f32.xlu0 %v419_v60 }
 0x18e   :  { %v465_v17 = vsel %vm464_vm11, %v628_v0, %v463_v13 }
 0x1b6   :  { %v449_v62 = vpop.xlane.xlu1 %448 }
 0x1b7   :  { %v450_v63 = vrot.slane %v449_v62, 4 }
 0x1b9   :  { %v451_v1 = vadd.f32 %v450_v63, %v449_v62 }
 0x1bb   :  { %v452_v3 = vrot.slane %v451_v1, 2 }
 0x1bd   :  { %v453_v8 = vadd.f32 %v452_v3, %v451_v1 }
 0x1bf   :  { %v454_v12 = vrot.slane %v453_v8, 1 }
 0x1c1   :  { %v455_v16 = vadd.f32 %v454_v12, %v453_v8 }
 0x200   :  { %v421_v4 = vpop.xlane.xlu0 %420 }
 0x201   :  { %v422_v6 = vrot.slane %v421_v4, 4 }
 0x203   :  { %v423_v7 = vadd.f32 %v422_v6, %v421_v4 }
 0x205   :  { %v424_v10 = vrot.slane %v423_v7, 2 }
 0x207   :  { %v425_v11 = vadd.f32 %v424_v10, %v423_v7 }
 0x209   :  { %v426_v14 = vrot.slane %v425_v11, 1 }
 0x20b   :  { %v427_v15 = vadd.f32 %v426_v14, %v425_v11 }
 0x20d   :  { %593 = vpush %v427_v15 }
 0x20e   :  { %595 = vpush %v455_v16 }
 0x20f   :  { %597 = vpush %v465_v17 }
 0x23e   :  { %s594_s2 = spop %593 }
 0x23f   :  { %s596_s3 = spop %595 }
 0x240   :  { %s457_s9 = smul.f32 0.01, %s596_s3  ;;  %s598_s13 = spop %597 }
 0x242   :  { %s458_s14 = sadd.f32 %s594_s2, %s457_s9 }
 0x244   :  { %s467_s15 = smul.f32 %s598_s13, %s458_s14 }
 0x246   :  { %469 = sst [smem:[#allocation12]] %s467_s15 }
 0x247   :  { %478 = dma.smem_to_hbm %s752_s16, 16, %s476_s12, [#allocation6]  }
 0x248   :  { %743 = dma.done.wait [#allocation6], 16  }
 0x249   :  { %744 = vsyncadd [#allocation6], 4294967280 }
 0x24a   :  { %483 = sfence }
 0x24b   :  { %484 = vsyncpa [#allocation5], 1 }
 0x24c   :  { %485 = vsyncpa [#allocation8], 1 }
 0x24d   :  { %486 = vsyncpa [#allocation11], 1 }
 0x24e   :  { %487 = vsyncpa [#allocation6], 1 }

</bundles_post_ra>
